<compile_context>
chip_gen: v7x
topology: tpu7x:2x2x1
jax: 0.10.0
libtpu: 0.0.40
codegen_flags: <defaults>
</compile_context>

<pallas_src>
import functools

import numpy as np
import jax
import jax.numpy as jnp
from jax import lax
from jax.experimental import pallas as pl
from jax.experimental.pallas import tpu as pltpu


def _nmsfilt_kernel(bbs_row_ref, conf_ref, out_ref, *,
                    nms_threshold, pre_threshold, max_output_boxes,
                    first_class, n_cls, picks_per_check):
    CH = conf_ref.shape[1]
    B = conf_ref.shape[2]
    neg_inf = jnp.float32(-jnp.inf)
    thr = jnp.float32(nms_threshold)

    cf_orig = conf_ref[0]                          # (CH, B)
    out_ref[0] = cf_orig                           # default: pass-through copy

    chunk_start = pl.program_id(1) * CH
    overlaps = jnp.logical_and(chunk_start < first_class + n_cls,
                               chunk_start + CH > first_class)

    @pl.when(overlaps)
    def _():
        # Which rows of this chunk fall inside the filtered class range.
        row = lax.broadcasted_iota(jnp.int32, (CH, 1), 0) + chunk_start
        do_filter = jnp.logical_and(row >= first_class, row < first_class + n_cls)

        # Row-layout boxes and per-box extents / areas, (1, B) each (built once).
        br = bbs_row_ref[0]                        # (4, B)
        xr, yr, wr, hr = br[0:1, :], br[1:2, :], br[2:3, :], br[3:4, :]
        xlo, xhi = xr - 0.5 * wr, xr + 0.5 * wr
        ylo, yhi = yr - 0.5 * hr, yr + 0.5 * hr
        area_r = wr * hr

        cf = cf_orig
        if pre_threshold >= 0.0:
            cf = jnp.where(cf <= pre_threshold, 0.0, cf)

        col_f = lax.broadcasted_iota(jnp.int32, (CH, B), 1).astype(jnp.float32)
        sentinel = jnp.float32(B)

        # `rem` tracks boxes neither picked nor suppressed yet (else -inf).
        # Only filtered rows participate in the greedy walk.
        rem = jnp.where(jnp.logical_and(do_filter, cf != 0.0), cf, neg_inf)

        def pick_once(state):
            cf, rem = state
            m = jnp.max(rem, axis=-1, keepdims=True)               # (CH,1) lane reduce
            valid = m > neg_inf                                     # derived, no extra reduce
            i_f = jnp.min(jnp.where(rem == m, col_f, sentinel),
                          axis=-1, keepdims=True)                   # lowest-index tie-break
            pick = jnp.logical_and(col_f == i_f, valid)             # (CH,B) one-hot (or empty)
            pickf = jnp.where(pick, 1.0, 0.0)
            # Picked-box coordinates per class row: 4 masked lane reductions (no MXU).
            x_p = jnp.sum(pickf * xr, axis=-1, keepdims=True)
            y_p = jnp.sum(pickf * yr, axis=-1, keepdims=True)
            w_p = jnp.sum(pickf * wr, axis=-1, keepdims=True)
            h_p = jnp.sum(pickf * hr, axis=-1, keepdims=True)
            rem = jnp.where(pick, neg_inf, rem)                     # picked boxes are processed
            # IoU of the picked box against every box: O(CH*B) VPU work.
            iw = jnp.minimum(x_p + 0.5 * w_p, xhi) - jnp.maximum(x_p - 0.5 * w_p, xlo)
            ih = jnp.minimum(y_p + 0.5 * h_p, yhi) - jnp.maximum(y_p - 0.5 * h_p, ylo)
            inter = jnp.where(jnp.logical_and(iw > 0.0, ih > 0.0), iw * ih, 0.0)
            union = w_p * h_p + area_r - inter
            # IoU > thr  <=>  inter > thr * union (union > 0); exact decision, no divide.
            suppress = jnp.logical_and(
                jnp.logical_and(union > 0.0, inter > thr * union),
                jnp.logical_and(rem > neg_inf, valid))              # only unprocessed boxes
            cf = jnp.where(suppress, 0.0, cf)
            rem = jnp.where(suppress, neg_inf, rem)
            return cf, rem

        K = picks_per_check
        max_outer = pl.cdiv(B, K)                  # safety bound; normal exit via `cont`

        def nms_cond(carry):
            step, _, _, cont = carry
            return jnp.logical_and(step < max_outer, cont > 0.0)

        def nms_body(carry):
            step, cf, rem, _ = carry
            cf, rem = lax.fori_loop(0, K, lambda _, s: pick_once(s), (cf, rem),
                                    unroll=True)
            # Post-update continue flag: checked once every K picks.
            cont = jnp.max(jnp.where(rem > neg_inf, 1.0, 0.0))
            return step + 1, cf, rem, cont

        cont0 = jnp.max(jnp.where(rem > neg_inf, 1.0, 0.0))
        _, cf, _, _ = lax.while_loop(nms_cond, nms_body,
                                     (jnp.int32(0), cf, rem, cont0))

        # ---- max_output_boxes: keep only top-k positive confidences per row ----
        if max_output_boxes > 0:
            def topk_body(_, keep):
                cand = jnp.logical_and(cf > 0.0, keep == 0.0)
                scores = jnp.where(cand, cf, neg_inf)
                m = jnp.max(scores, axis=-1, keepdims=True)
                valid = m > neg_inf
                i_f = jnp.min(jnp.where(scores == m, col_f, sentinel),
                              axis=-1, keepdims=True)
                return keep + jnp.where(jnp.logical_and(col_f == i_f, valid), 1.0, 0.0)

            keep = lax.fori_loop(0, max_output_boxes, topk_body,
                                 jnp.zeros((CH, B), jnp.float32),
                                 unroll=bool(max_output_boxes <= 8))
            cf = jnp.where(jnp.logical_and(cf > 0.0, keep == 0.0), 0.0, cf)

        # Filtered rows get the NMS result; pass-through rows keep the input.
        out_ref[0] = jnp.where(do_filter, cf, cf_orig)


def nms_filter(bbs, conf, *, nms_threshold=0.45, classes=1, pre_threshold=-1.0,
               first_class=0, max_output_boxes=-1):
    """Pallas TPU equivalent of NMSFilter.forward (return_bbs=False)."""
    N, B, four = bbs.shape
    assert four == 4
    Nc, C, Bc = conf.shape
    assert Nc == N and Bc == B
    assert first_class >= 0
    n_cls = (C - first_class) if classes <= 0 else int(classes)
    assert 0 < n_cls and first_class + n_cls <= C

    bbs = bbs.astype(jnp.float32)
    conf = conf.astype(jnp.float32)

    # Class-chunk height (sublane group).  Multiple of 8 for the (8,128) tiling
    # rule, except when C itself is smaller (block dim == full array dim is legal).
    CH = 8
    if C <= CH:
        CH = C
        C_p = C
    else:
        C_p = ((C + CH - 1) // CH) * CH
    n_chunks = C_p // CH
    # TODO(synk): on v7x with N * n_chunks == 1 one TensorCore is idle; splitting the
    # single chunk would need CH < 8 (sublane rule), so it is not attempted here.

    conf_p = conf if C_p == C else jnp.pad(conf, ((0, 0), (0, C_p - C), (0, 0)))
    bbs_rows = jnp.transpose(bbs, (0, 2, 1))       # (N, 4, B) row layout (tiny copy)

    kernel = functools.partial(
        _nmsfilt_kernel,
        nms_threshold=float(nms_threshold),
        pre_threshold=float(pre_threshold),
        max_output_boxes=int(max_output_boxes),
        first_class=int(first_class),
        n_cls=int(n_cls),
        picks_per_check=4,
    )

    out = pl.pallas_call(
        kernel,
        out_shape=jax.ShapeDtypeStruct((N, C_p, B), jnp.float32),
        grid_spec=pltpu.PrefetchScalarGridSpec(
            num_scalar_prefetch=0,
            grid=(N, n_chunks),
            in_specs=[
                # Boxes (row layout): block index constant across the class axis,
                # so Pallas skips the re-DMA for consecutive chunks of a batch.
                pl.BlockSpec((1, 4, B), lambda n, c: (n, 0, 0)),
                pl.BlockSpec((1, CH, B), lambda n, c: (n, c, 0)),
            ],
            out_specs=pl.BlockSpec((1, CH, B), lambda n, c: (n, c, 0)),
        ),
        compiler_params=pltpu.CompilerParams(
            dimension_semantics=("parallel", "parallel")),
    )(bbs_rows, conf_p)

    return out if C_p == C else out[:, :C, :]


def _ref_nmsfilter(bbs, conf, *, nms_threshold=0.45, classes=1, pre_threshold=-1.0,
                   first_class=0, max_output_boxes=-1):
    """Pure NumPy reference mirroring the mictorch CPU nmsfilt semantics."""
    bbs = np.asarray(bbs, dtype=np.float32)
    conf = np.asarray(conf, dtype=np.float32)
    out = conf.copy()
    N, B, _ = bbs.shape
    C = conf.shape[1]
    n_cls = (C - first_class) if classes <= 0 else classes
    thr = np.float32(nms_threshold)
    half = np.float32(0.5)
    for n in range(N):
        x, y, w, h = bbs[n, :, 0], bbs[n, :, 1], bbs[n, :, 2], bbs[n, :, 3]
        xc, yc, wc, hc = x[:, None], y[:, None], w[:, None], h[:, None]
        xr, yr, wr, hr = x[None, :], y[None, :], w[None, :], h[None, :]
        iw = np.minimum(xc + wc * half, xr + wr * half) - np.maximum(xc - wc * half, xr - wr * half)
        ih = np.minimum(yc + hc * half, yr + hr * half) - np.maximum(yc - hc * half, yr - hr * half)
        inter = np.where((iw > 0) & (ih > 0), iw * ih, np.float32(0))
        union = wc * hc + wr * hr - inter
        sup = (union > 0) & (inter > thr * union)
        for c in range(first_class, first_class + n_cls):
            cf = out[n, c]
            if pre_threshold >= 0:
                cf[cf <= np.float32(pre_threshold)] = 0.0
            order = np.argsort(-cf, kind="stable")
            for a in range(B):
                i = order[a]
                if cf[i] == 0.0:
                    continue
                for b in range(a + 1, B):
                    j = order[b]
                    if sup[i, j]:
                        cf[j] = 0.0
            if max_output_boxes > 0:
                pos = np.flatnonzero(cf > 0.0)
                if pos.size > max_output_boxes:
                    o = pos[np.argsort(-cf[pos], kind="stable")]
                    cf[o[max_output_boxes:]] = 0.0
    return out


if __name__ == "__main__":
    key = jax.random.PRNGKey(0)
    k1, k2, k3 = jax.random.split(key, 3)
    N, B, C = 2, 100, 6                       # batch, boxes (non-multiple of 128), class channels

    centers = jax.random.uniform(k1, (N, B, 2), jnp.float32, 0.0, 1.0)
    sizes = jax.random.uniform(k2, (N, B, 2), jnp.float32, 0.05, 0.35)
    bbs = jnp.concatenate([centers, sizes], axis=-1)          # (N, B, 4) cx,cy,w,h
    conf = jax.random.uniform(k3, (N, C, B), jnp.float32, 0.0, 1.0)

    params = dict(nms_threshold=0.45, classes=3, pre_threshold=0.05,
                  first_class=1, max_output_boxes=10)

    out = jax.block_until_ready(nms_filter(bbs, conf, **params))

    ref = _ref_nmsfilter(np.asarray(bbs), np.asarray(conf), **params)
    np.testing.assert_allclose(np.asarray(out), ref, rtol=0.0, atol=1e-6)

    print("KERNEL_OK")
</pallas_src>

<mosaic_0001>
module attributes {stable_mosaic.version = 11 : i64} {
  func.func @_nmsfilt_kernel(%arg0: i32, %arg1: i32, %arg2: memref<1x4x100xf32, #tpu.memory_space<vmem>>, %arg3: memref<1x6x100xf32, #tpu.memory_space<vmem>>, %arg4: memref<1x6x100xf32, #tpu.memory_space<vmem>>) attributes {dimension_semantics = [#tpu.dimension_semantics<parallel>, #tpu.dimension_semantics<parallel>], iteration_bounds = array<i64: 2, 1>, scalar_prefetch = 0 : i64, scratch_operands = 0 : i64, tpu.core_type = #tpu.core_type<tc>, window_params = [{transform_indices = @transform_0, window_bounds = array<i64: 1, 4, 100>}, {transform_indices = @transform_1, window_bounds = array<i64: 1, 6, 100>}, {transform_indices = @transform_2, window_bounds = array<i64: 1, 6, 100>}]} {
    %c0 = arith.constant 0 : index
    %c0_0 = arith.constant 0 : index
    %c0_1 = arith.constant 0 : index
    %0 = vector.load %arg3[%c0, %c0_0, %c0_1] : memref<1x6x100xf32, #tpu.memory_space<vmem>>, vector<1x6x100xf32>
    %1 = vector.shape_cast %0 : vector<1x6x100xf32> to vector<6x100xf32>
    %c0_2 = arith.constant 0 : index
    %c0_3 = arith.constant 0 : index
    %c0_4 = arith.constant 0 : index
    %2 = vector.load %arg4[%c0_2, %c0_3, %c0_4] : memref<1x6x100xf32, #tpu.memory_space<vmem>>, vector<1x6x100xf32>
    %3 = vector.shape_cast %2 : vector<1x6x100xf32> to vector<6x100xf32>
    %4 = vector.shape_cast %1 : vector<6x100xf32> to vector<1x6x100xf32>
    tpu.vector_store %arg4[%c0_2, %c0_3, %c0_4], %4 {strides = array<i32>} : memref<1x6x100xf32, #tpu.memory_space<vmem>>, vector<1x6x100xf32>,
    %c6_i32 = arith.constant 6 : i32
    %5 = arith.muli %arg1, %c6_i32 : i32
    %c4_i32 = arith.constant 4 : i32
    %6 = arith.cmpi slt, %5, %c4_i32 : i32
    %c6_i32_5 = arith.constant 6 : i32
    %7 = arith.addi %5, %c6_i32_5 : i32
    %c1_i32 = arith.constant 1 : i32
    %8 = arith.cmpi sgt, %7, %c1_i32 : i32
    %9 = arith.andi %6, %8 : i1
    %10 = arith.extui %9 : i1 to i32
    %cst = arith.constant 0xFF800000 : f32
    %cst_6 = arith.constant 4.500000e-01 : f32
    %c0_i32 = arith.constant 0 : i32
    %11 = arith.cmpi ne, %10, %c0_i32 : i32
    scf.if %11 {
      %12 = tpu.iota {dimensions = array<i32: 0>} : vector<6x1xi32>
      %13 = vector.broadcast %5 : i32 to vector<6x1xi32>
      %14 = arith.addi %12, %13 : vector<6x1xi32>
      %c1_i32_7 = arith.constant 1 : i32
      %15 = vector.broadcast %c1_i32_7 : i32 to vector<6x1xi32>
      %16 = arith.cmpi sge, %14, %15 : vector<6x1xi32>
      %c4_i32_8 = arith.constant 4 : i32
      %17 = vector.broadcast %c4_i32_8 : i32 to vector<6x1xi32>
      %18 = arith.cmpi slt, %14, %17 : vector<6x1xi32>
      %19 = arith.andi %16, %18 : vector<6x1xi1>
      %c0_9 = arith.constant 0 : index
      %c0_10 = arith.constant 0 : index
      %c0_11 = arith.constant 0 : index
      %20 = vector.load %arg2[%c0_9, %c0_10, %c0_11] : memref<1x4x100xf32, #tpu.memory_space<vmem>>, vector<1x4x100xf32>
      %21 = vector.shape_cast %20 : vector<1x4x100xf32> to vector<4x100xf32>
      %22 = vector.extract_strided_slice %21 {offsets = [0, 0], sizes = [1, 100], strides = [1, 1]} : vector<4x100xf32> to vector<1x100xf32>
      %23 = vector.extract_strided_slice %21 {offsets = [1, 0], sizes = [1, 100], strides = [1, 1]} : vector<4x100xf32> to vector<1x100xf32>
      %24 = vector.extract_strided_slice %21 {offsets = [2, 0], sizes = [1, 100], strides = [1, 1]} : vector<4x100xf32> to vector<1x100xf32>
      %25 = vector.extract_strided_slice %21 {offsets = [3, 0], sizes = [1, 100], strides = [1, 1]} : vector<4x100xf32> to vector<1x100xf32>
      %cst_12 = arith.constant 5.000000e-01 : f32
      %26 = vector.broadcast %cst_12 : f32 to vector<1x100xf32>
      %27 = arith.mulf %26, %24 : vector<1x100xf32>
      %28 = arith.subf %22, %27 : vector<1x100xf32>
      %cst_13 = arith.constant 5.000000e-01 : f32
      %29 = vector.broadcast %cst_13 : f32 to vector<1x100xf32>
      %30 = arith.mulf %29, %24 : vector<1x100xf32>
      %31 = arith.addf %22, %30 : vector<1x100xf32>
      %cst_14 = arith.constant 5.000000e-01 : f32
      %32 = vector.broadcast %cst_14 : f32 to vector<1x100xf32>
      %33 = arith.mulf %32, %25 : vector<1x100xf32>
      %34 = arith.subf %23, %33 : vector<1x100xf32>
      %cst_15 = arith.constant 5.000000e-01 : f32
      %35 = vector.broadcast %cst_15 : f32 to vector<1x100xf32>
      %36 = arith.mulf %35, %25 : vector<1x100xf32>
      %37 = arith.addf %23, %36 : vector<1x100xf32>
      %38 = arith.mulf %24, %25 : vector<1x100xf32>
      %cst_16 = arith.constant 5.000000e-02 : f32
      %39 = vector.broadcast %cst_16 : f32 to vector<6x100xf32>
      %40 = arith.cmpf ole, %1, %39 : vector<6x100xf32>
      %cst_17 = arith.constant 0.000000e+00 : f32
      %41 = vector.broadcast %cst_17 : f32 to vector<6x100xf32>
      %42 = arith.select %40, %41, %1 : vector<6x100xi1>, vector<6x100xf32>
      %43 = tpu.iota {dimensions = array<i32: 1>} : vector<6x100xi32>
      %44 = arith.sitofp %43 : vector<6x100xi32> to vector<6x100xf32>
      %cst_18 = arith.constant 0.000000e+00 : f32
      %45 = vector.broadcast %cst_18 : f32 to vector<6x100xf32>
      %46 = arith.cmpf one, %42, %45 : vector<6x100xf32>
      %47 = vector.broadcast %19 : vector<6x1xi1> to vector<6x100xi1>
      %48 = arith.andi %47, %46 : vector<6x100xi1>
      %49 = vector.broadcast %cst : f32 to vector<6x100xf32>
      %50 = arith.select %48, %42, %49 : vector<6x100xi1>, vector<6x100xf32>
      %51 = vector.broadcast %cst : f32 to vector<6x100xf32>
      %52 = arith.cmpf ogt, %50, %51 : vector<6x100xf32>
      %cst_19 = arith.constant 1.000000e+00 : f32
      %cst_20 = arith.constant 0.000000e+00 : f32
      %53 = vector.broadcast %cst_19 : f32 to vector<6x100xf32>
      %54 = vector.broadcast %cst_20 : f32 to vector<6x100xf32>
      %55 = arith.select %52, %53, %54 : vector<6x100xi1>, vector<6x100xf32>
      %56 = vector.shape_cast %55 : vector<6x100xf32> to vector<1x6x100xf32>
      %cst_21 = arith.constant dense<0xFF800000> : vector<1xf32>
      %57 = vector.multi_reduction <maximumf>, %56, %cst_21 [1, 2] : vector<1x6x100xf32> to vector<1xf32>
      %58 = vector.shape_cast %57 : vector<1xf32> to vector<1x1x1xf32>
      %59 = vector.extract %58[0, 0, 0] : f32 from vector<1x1x1xf32>
      %cst_22 = arith.constant 1.000000e+02 : f32
      %c0_i32_23 = arith.constant 0 : i32
      %60:4 = scf.while (%arg5 = %c0_i32_23, %arg6 = %42, %arg7 = %50, %arg8 = %59) : (i32, vector<6x100xf32>, vector<6x100xf32>, f32) -> (i32, vector<6x100xf32>, vector<6x100xf32>, f32) {
        %c25_i32 = arith.constant 25 : i32
        %77 = arith.cmpi slt, %arg5, %c25_i32 : i32
        %cst_34 = arith.constant 0.000000e+00 : f32
        %78 = arith.cmpf ogt, %arg8, %cst_34 : f32
        %79 = arith.andi %77, %78 : i1
        scf.condition(%79) %arg5, %arg6, %arg7, %arg8 : i32, vector<6x100xf32>, vector<6x100xf32>, f32
      } do {
      ^bb0(%arg5: i32, %arg6: vector<6x100xf32>, %arg7: vector<6x100xf32>, %arg8: f32):
        %c0_i32_34 = arith.constant 0 : i32
        %cst_35 = arith.constant dense<0xFF800000> : vector<6xf32>
        %77 = vector.multi_reduction <maximumf>, %arg7, %cst_35 [1] : vector<6x100xf32> to vector<6xf32>
        %78 = vector.shape_cast %77 : vector<6xf32> to vector<6x1xf32>
        %79 = vector.broadcast %cst : f32 to vector<6x1xf32>
        %80 = arith.cmpf ogt, %78, %79 : vector<6x1xf32>
        %81 = vector.broadcast %78 : vector<6x1xf32> to vector<6x100xf32>
        %82 = arith.cmpf oeq, %arg7, %81 : vector<6x100xf32>
        %83 = vector.broadcast %cst_22 : f32 to vector<6x100xf32>
        %84 = arith.select %82, %44, %83 : vector<6x100xi1>, vector<6x100xf32>
        %cst_36 = arith.constant dense<0x7F800000> : vector<6xf32>
        %85 = vector.multi_reduction <minimumf>, %84, %cst_36 [1] : vector<6x100xf32> to vector<6xf32>
        %86 = vector.shape_cast %85 : vector<6xf32> to vector<6x1xf32>
        %87 = vector.broadcast %86 : vector<6x1xf32> to vector<6x100xf32>
        %88 = arith.cmpf oeq, %44, %87 : vector<6x100xf32>
        %89 = vector.broadcast %80 : vector<6x1xi1> to vector<6x100xi1>
        %90 = arith.andi %88, %89 : vector<6x100xi1>
        %cst_37 = arith.constant 1.000000e+00 : f32
        %cst_38 = arith.constant 0.000000e+00 : f32
        %91 = vector.broadcast %cst_37 : f32 to vector<6x100xf32>
        %92 = vector.broadcast %cst_38 : f32 to vector<6x100xf32>
        %93 = arith.select %90, %91, %92 : vector<6x100xi1>, vector<6x100xf32>
        %94 = vector.broadcast %22 : vector<1x100xf32> to vector<6x100xf32>
        %95 = arith.mulf %93, %94 : vector<6x100xf32>
        %cst_39 = arith.constant dense<0.000000e+00> : vector<6xf32>
        %96 = vector.multi_reduction <add>, %95, %cst_39 [1] : vector<6x100xf32> to vector<6xf32>
        %97 = vector.shape_cast %96 : vector<6xf32> to vector<6x1xf32>
        %98 = vector.broadcast %23 : vector<1x100xf32> to vector<6x100xf32>
        %99 = arith.mulf %93, %98 : vector<6x100xf32>
        %cst_40 = arith.constant dense<0.000000e+00> : vector<6xf32>
        %100 = vector.multi_reduction <add>, %99, %cst_40 [1] : vector<6x100xf32> to vector<6xf32>
        %101 = vector.shape_cast %100 : vector<6xf32> to vector<6x1xf32>
        %102 = vector.broadcast %24 : vector<1x100xf32> to vector<6x100xf32>
        %103 = arith.mulf %93, %102 : vector<6x100xf32>
        %cst_41 = arith.constant dense<0.000000e+00> : vector<6xf32>
        %104 = vector.multi_reduction <add>, %103, %cst_41 [1] : vector<6x100xf32> to vector<6xf32>
        %105 = vector.shape_cast %104 : vector<6xf32> to vector<6x1xf32>
        %106 = vector.broadcast %25 : vector<1x100xf32> to vector<6x100xf32>
        %107 = arith.mulf %93, %106 : vector<6x100xf32>
        %cst_42 = arith.constant dense<0.000000e+00> : vector<6xf32>
        %108 = vector.multi_reduction <add>, %107, %cst_42 [1] : vector<6x100xf32> to vector<6xf32>
        %109 = vector.shape_cast %108 : vector<6xf32> to vector<6x1xf32>
        %110 = vector.broadcast %cst : f32 to vector<6x100xf32>
        %111 = arith.select %90, %110, %arg7 : vector<6x100xi1>, vector<6x100xf32>
        %cst_43 = arith.constant 5.000000e-01 : f32
        %112 = vector.broadcast %cst_43 : f32 to vector<6x1xf32>
        %113 = arith.mulf %112, %105 : vector<6x1xf32>
        %114 = arith.addf %97, %113 : vector<6x1xf32>
        %115 = vector.broadcast %114 : vector<6x1xf32> to vector<6x100xf32>
        %116 = vector.broadcast %31 : vector<1x100xf32> to vector<6x100xf32>
        %117 = arith.minimumf %115, %116 : vector<6x100xf32>
        %cst_44 = arith.constant 5.000000e-01 : f32
        %118 = vector.broadcast %cst_44 : f32 to vector<6x1xf32>
        %119 = arith.mulf %118, %105 : vector<6x1xf32>
        %120 = arith.subf %97, %119 : vector<6x1xf32>
        %121 = vector.broadcast %120 : vector<6x1xf32> to vector<6x100xf32>
        %122 = vector.broadcast %28 : vector<1x100xf32> to vector<6x100xf32>
        %123 = arith.maximumf %121, %122 : vector<6x100xf32>
        %124 = arith.subf %117, %123 : vector<6x100xf32>
        %cst_45 = arith.constant 5.000000e-01 : f32
        %125 = vector.broadcast %cst_45 : f32 to vector<6x1xf32>
        %126 = arith.mulf %125, %109 : vector<6x1xf32>
        %127 = arith.addf %101, %126 : vector<6x1xf32>
        %128 = vector.broadcast %127 : vector<6x1xf32> to vector<6x100xf32>
        %129 = vector.broadcast %37 : vector<1x100xf32> to vector<6x100xf32>
        %130 = arith.minimumf %128, %129 : vector<6x100xf32>
        %cst_46 = arith.constant 5.000000e-01 : f32
        %131 = vector.broadcast %cst_46 : f32 to vector<6x1xf32>
        %132 = arith.mulf %131, %109 : vector<6x1xf32>
        %133 = arith.subf %101, %132 : vector<6x1xf32>
        %134 = vector.broadcast %133 : vector<6x1xf32> to vector<6x100xf32>
        %135 = vector.broadcast %34 : vector<1x100xf32> to vector<6x100xf32>
        %136 = arith.maximumf %134, %135 : vector<6x100xf32>
        %137 = arith.subf %130, %136 : vector<6x100xf32>
        %cst_47 = arith.constant 0.000000e+00 : f32
        %138 = vector.broadcast %cst_47 : f32 to vector<6x100xf32>
        %139 = arith.cmpf ogt, %124, %138 : vector<6x100xf32>
        %cst_48 = arith.constant 0.000000e+00 : f32
        %140 = vector.broadcast %cst_48 : f32 to vector<6x100xf32>
        %141 = arith.cmpf ogt, %137, %140 : vector<6x100xf32>
        %142 = arith.andi %139, %141 : vector<6x100xi1>
        %143 = arith.mulf %124, %137 : vector<6x100xf32>
        %cst_49 = arith.constant 0.000000e+00 : f32
        %144 = vector.broadcast %cst_49 : f32 to vector<6x100xf32>
        %145 = arith.select %142, %143, %144 : vector<6x100xi1>, vector<6x100xf32>
        %146 = arith.mulf %105, %109 : vector<6x1xf32>
        %147 = vector.broadcast %146 : vector<6x1xf32> to vector<6x100xf32>
        %148 = vector.broadcast %38 : vector<1x100xf32> to vector<6x100xf32>
        %149 = arith.addf %147, %148 : vector<6x100xf32>
        %150 = arith.subf %149, %145 : vector<6x100xf32>
        %cst_50 = arith.constant 0.000000e+00 : f32
        %151 = vector.broadcast %cst_50 : f32 to vector<6x100xf32>
        %152 = arith.cmpf ogt, %150, %151 : vector<6x100xf32>
        %153 = vector.broadcast %cst_6 : f32 to vector<6x100xf32>
        %154 = arith.mulf %153, %150 : vector<6x100xf32>
        %155 = arith.cmpf ogt, %145, %154 : vector<6x100xf32>
        %156 = arith.andi %152, %155 : vector<6x100xi1>
        %157 = vector.broadcast %cst : f32 to vector<6x100xf32>
        %158 = arith.cmpf ogt, %111, %157 : vector<6x100xf32>
        %159 = vector.broadcast %80 : vector<6x1xi1> to vector<6x100xi1>
        %160 = arith.andi %158, %159 : vector<6x100xi1>
        %161 = arith.andi %156, %160 : vector<6x100xi1>
        %cst_51 = arith.constant 0.000000e+00 : f32
        %162 = vector.broadcast %cst_51 : f32 to vector<6x100xf32>
        %163 = arith.select %161, %162, %arg6 : vector<6x100xi1>, vector<6x100xf32>
        %164 = vector.broadcast %cst : f32 to vector<6x100xf32>
        %165 = arith.select %161, %164, %111 : vector<6x100xi1>, vector<6x100xf32>
        %c1_i32_52 = arith.constant 1 : i32
        %cst_53 = arith.constant dense<0xFF800000> : vector<6xf32>
        %166 = vector.multi_reduction <maximumf>, %165, %cst_53 [1] : vector<6x100xf32> to vector<6xf32>
        %167 = vector.shape_cast %166 : vector<6xf32> to vector<6x1xf32>
        %168 = vector.broadcast %cst : f32 to vector<6x1xf32>
        %169 = arith.cmpf ogt, %167, %168 : vector<6x1xf32>
        %170 = vector.broadcast %167 : vector<6x1xf32> to vector<6x100xf32>
        %171 = arith.cmpf oeq, %165, %170 : vector<6x100xf32>
        %172 = vector.broadcast %cst_22 : f32 to vector<6x100xf32>
        %173 = arith.select %171, %44, %172 : vector<6x100xi1>, vector<6x100xf32>
        %cst_54 = arith.constant dense<0x7F800000> : vector<6xf32>
        %174 = vector.multi_reduction <minimumf>, %173, %cst_54 [1] : vector<6x100xf32> to vector<6xf32>
        %175 = vector.shape_cast %174 : vector<6xf32> to vector<6x1xf32>
        %176 = vector.broadcast %175 : vector<6x1xf32> to vector<6x100xf32>
        %177 = arith.cmpf oeq, %44, %176 : vector<6x100xf32>
        %178 = vector.broadcast %169 : vector<6x1xi1> to vector<6x100xi1>
        %179 = arith.andi %177, %178 : vector<6x100xi1>
        %cst_55 = arith.constant 1.000000e+00 : f32
        %cst_56 = arith.constant 0.000000e+00 : f32
        %180 = vector.broadcast %cst_55 : f32 to vector<6x100xf32>
        %181 = vector.broadcast %cst_56 : f32 to vector<6x100xf32>
        %182 = arith.select %179, %180, %181 : vector<6x100xi1>, vector<6x100xf32>
        %183 = vector.broadcast %22 : vector<1x100xf32> to vector<6x100xf32>
        %184 = arith.mulf %182, %183 : vector<6x100xf32>
        %cst_57 = arith.constant dense<0.000000e+00> : vector<6xf32>
        %185 = vector.multi_reduction <add>, %184, %cst_57 [1] : vector<6x100xf32> to vector<6xf32>
        %186 = vector.shape_cast %185 : vector<6xf32> to vector<6x1xf32>
        %187 = vector.broadcast %23 : vector<1x100xf32> to vector<6x100xf32>
        %188 = arith.mulf %182, %187 : vector<6x100xf32>
        %cst_58 = arith.constant dense<0.000000e+00> : vector<6xf32>
        %189 = vector.multi_reduction <add>, %188, %cst_58 [1] : vector<6x100xf32> to vector<6xf32>
        %190 = vector.shape_cast %189 : vector<6xf32> to vector<6x1xf32>
        %191 = vector.broadcast %24 : vector<1x100xf32> to vector<6x100xf32>
        %192 = arith.mulf %182, %191 : vector<6x100xf32>
        %cst_59 = arith.constant dense<0.000000e+00> : vector<6xf32>
        %193 = vector.multi_reduction <add>, %192, %cst_59 [1] : vector<6x100xf32> to vector<6xf32>
        %194 = vector.shape_cast %193 : vector<6xf32> to vector<6x1xf32>
        %195 = vector.broadcast %25 : vector<1x100xf32> to vector<6x100xf32>
        %196 = arith.mulf %182, %195 : vector<6x100xf32>
        %cst_60 = arith.constant dense<0.000000e+00> : vector<6xf32>
        %197 = vector.multi_reduction <add>, %196, %cst_60 [1] : vector<6x100xf32> to vector<6xf32>
        %198 = vector.shape_cast %197 : vector<6xf32> to vector<6x1xf32>
        %199 = vector.broadcast %cst : f32 to vector<6x100xf32>
        %200 = arith.select %179, %199, %165 : vector<6x100xi1>, vector<6x100xf32>
        %cst_61 = arith.constant 5.000000e-01 : f32
        %201 = vector.broadcast %cst_61 : f32 to vector<6x1xf32>
        %202 = arith.mulf %201, %194 : vector<6x1xf32>
        %203 = arith.addf %186, %202 : vector<6x1xf32>
        %204 = vector.broadcast %203 : vector<6x1xf32> to vector<6x100xf32>
        %205 = vector.broadcast %31 : vector<1x100xf32> to vector<6x100xf32>
        %206 = arith.minimumf %204, %205 : vector<6x100xf32>
        %cst_62 = arith.constant 5.000000e-01 : f32
        %207 = vector.broadcast %cst_62 : f32 to vector<6x1xf32>
        %208 = arith.mulf %207, %194 : vector<6x1xf32>
        %209 = arith.subf %186, %208 : vector<6x1xf32>
        %210 = vector.broadcast %209 : vector<6x1xf32> to vector<6x100xf32>
        %211 = vector.broadcast %28 : vector<1x100xf32> to vector<6x100xf32>
        %212 = arith.maximumf %210, %211 : vector<6x100xf32>
        %213 = arith.subf %206, %212 : vector<6x100xf32>
        %cst_63 = arith.constant 5.000000e-01 : f32
        %214 = vector.broadcast %cst_63 : f32 to vector<6x1xf32>
        %215 = arith.mulf %214, %198 : vector<6x1xf32>
        %216 = arith.addf %190, %215 : vector<6x1xf32>
        %217 = vector.broadcast %216 : vector<6x1xf32> to vector<6x100xf32>
        %218 = vector.broadcast %37 : vector<1x100xf32> to vector<6x100xf32>
        %219 = arith.minimumf %217, %218 : vector<6x100xf32>
        %cst_64 = arith.constant 5.000000e-01 : f32
        %220 = vector.broadcast %cst_64 : f32 to vector<6x1xf32>
        %221 = arith.mulf %220, %198 : vector<6x1xf32>
        %222 = arith.subf %190, %221 : vector<6x1xf32>
        %223 = vector.broadcast %222 : vector<6x1xf32> to vector<6x100xf32>
        %224 = vector.broadcast %34 : vector<1x100xf32> to vector<6x100xf32>
        %225 = arith.maximumf %223, %224 : vector<6x100xf32>
        %226 = arith.subf %219, %225 : vector<6x100xf32>
        %cst_65 = arith.constant 0.000000e+00 : f32
        %227 = vector.broadcast %cst_65 : f32 to vector<6x100xf32>
        %228 = arith.cmpf ogt, %213, %227 : vector<6x100xf32>
        %cst_66 = arith.constant 0.000000e+00 : f32
        %229 = vector.broadcast %cst_66 : f32 to vector<6x100xf32>
        %230 = arith.cmpf ogt, %226, %229 : vector<6x100xf32>
        %231 = arith.andi %228, %230 : vector<6x100xi1>
        %232 = arith.mulf %213, %226 : vector<6x100xf32>
        %cst_67 = arith.constant 0.000000e+00 : f32
        %233 = vector.broadcast %cst_67 : f32 to vector<6x100xf32>
        %234 = arith.select %231, %232, %233 : vector<6x100xi1>, vector<6x100xf32>
        %235 = arith.mulf %194, %198 : vector<6x1xf32>
        %236 = vector.broadcast %235 : vector<6x1xf32> to vector<6x100xf32>
        %237 = vector.broadcast %38 : vector<1x100xf32> to vector<6x100xf32>
        %238 = arith.addf %236, %237 : vector<6x100xf32>
        %239 = arith.subf %238, %234 : vector<6x100xf32>
        %cst_68 = arith.constant 0.000000e+00 : f32
        %240 = vector.broadcast %cst_68 : f32 to vector<6x100xf32>
        %241 = arith.cmpf ogt, %239, %240 : vector<6x100xf32>
        %242 = vector.broadcast %cst_6 : f32 to vector<6x100xf32>
        %243 = arith.mulf %242, %239 : vector<6x100xf32>
        %244 = arith.cmpf ogt, %234, %243 : vector<6x100xf32>
        %245 = arith.andi %241, %244 : vector<6x100xi1>
        %246 = vector.broadcast %cst : f32 to vector<6x100xf32>
        %247 = arith.cmpf ogt, %200, %246 : vector<6x100xf32>
        %248 = vector.broadcast %169 : vector<6x1xi1> to vector<6x100xi1>
        %249 = arith.andi %247, %248 : vector<6x100xi1>
        %250 = arith.andi %245, %249 : vector<6x100xi1>
        %cst_69 = arith.constant 0.000000e+00 : f32
        %251 = vector.broadcast %cst_69 : f32 to vector<6x100xf32>
        %252 = arith.select %250, %251, %163 : vector<6x100xi1>, vector<6x100xf32>
        %253 = vector.broadcast %cst : f32 to vector<6x100xf32>
        %254 = arith.select %250, %253, %200 : vector<6x100xi1>, vector<6x100xf32>
        %c2_i32 = arith.constant 2 : i32
        %cst_70 = arith.constant dense<0xFF800000> : vector<6xf32>
        %255 = vector.multi_reduction <maximumf>, %254, %cst_70 [1] : vector<6x100xf32> to vector<6xf32>
        %256 = vector.shape_cast %255 : vector<6xf32> to vector<6x1xf32>
        %257 = vector.broadcast %cst : f32 to vector<6x1xf32>
        %258 = arith.cmpf ogt, %256, %257 : vector<6x1xf32>
        %259 = vector.broadcast %256 : vector<6x1xf32> to vector<6x100xf32>
        %260 = arith.cmpf oeq, %254, %259 : vector<6x100xf32>
        %261 = vector.broadcast %cst_22 : f32 to vector<6x100xf32>
        %262 = arith.select %260, %44, %261 : vector<6x100xi1>, vector<6x100xf32>
        %cst_71 = arith.constant dense<0x7F800000> : vector<6xf32>
        %263 = vector.multi_reduction <minimumf>, %262, %cst_71 [1] : vector<6x100xf32> to vector<6xf32>
        %264 = vector.shape_cast %263 : vector<6xf32> to vector<6x1xf32>
        %265 = vector.broadcast %264 : vector<6x1xf32> to vector<6x100xf32>
        %266 = arith.cmpf oeq, %44, %265 : vector<6x100xf32>
        %267 = vector.broadcast %258 : vector<6x1xi1> to vector<6x100xi1>
        %268 = arith.andi %266, %267 : vector<6x100xi1>
        %cst_72 = arith.constant 1.000000e+00 : f32
        %cst_73 = arith.constant 0.000000e+00 : f32
        %269 = vector.broadcast %cst_72 : f32 to vector<6x100xf32>
        %270 = vector.broadcast %cst_73 : f32 to vector<6x100xf32>
        %271 = arith.select %268, %269, %270 : vector<6x100xi1>, vector<6x100xf32>
        %272 = vector.broadcast %22 : vector<1x100xf32> to vector<6x100xf32>
        %273 = arith.mulf %271, %272 : vector<6x100xf32>
        %cst_74 = arith.constant dense<0.000000e+00> : vector<6xf32>
        %274 = vector.multi_reduction <add>, %273, %cst_74 [1] : vector<6x100xf32> to vector<6xf32>
        %275 = vector.shape_cast %274 : vector<6xf32> to vector<6x1xf32>
        %276 = vector.broadcast %23 : vector<1x100xf32> to vector<6x100xf32>
        %277 = arith.mulf %271, %276 : vector<6x100xf32>
        %cst_75 = arith.constant dense<0.000000e+00> : vector<6xf32>
        %278 = vector.multi_reduction <add>, %277, %cst_75 [1] : vector<6x100xf32> to vector<6xf32>
        %279 = vector.shape_cast %278 : vector<6xf32> to vector<6x1xf32>
        %280 = vector.broadcast %24 : vector<1x100xf32> to vector<6x100xf32>
        %281 = arith.mulf %271, %280 : vector<6x100xf32>
        %cst_76 = arith.constant dense<0.000000e+00> : vector<6xf32>
        %282 = vector.multi_reduction <add>, %281, %cst_76 [1] : vector<6x100xf32> to vector<6xf32>
        %283 = vector.shape_cast %282 : vector<6xf32> to vector<6x1xf32>
        %284 = vector.broadcast %25 : vector<1x100xf32> to vector<6x100xf32>
        %285 = arith.mulf %271, %284 : vector<6x100xf32>
        %cst_77 = arith.constant dense<0.000000e+00> : vector<6xf32>
        %286 = vector.multi_reduction <add>, %285, %cst_77 [1] : vector<6x100xf32> to vector<6xf32>
        %287 = vector.shape_cast %286 : vector<6xf32> to vector<6x1xf32>
        %288 = vector.broadcast %cst : f32 to vector<6x100xf32>
        %289 = arith.select %268, %288, %254 : vector<6x100xi1>, vector<6x100xf32>
        %cst_78 = arith.constant 5.000000e-01 : f32
        %290 = vector.broadcast %cst_78 : f32 to vector<6x1xf32>
        %291 = arith.mulf %290, %283 : vector<6x1xf32>
        %292 = arith.addf %275, %291 : vector<6x1xf32>
        %293 = vector.broadcast %292 : vector<6x1xf32> to vector<6x100xf32>
        %294 = vector.broadcast %31 : vector<1x100xf32> to vector<6x100xf32>
        %295 = arith.minimumf %293, %294 : vector<6x100xf32>
        %cst_79 = arith.constant 5.000000e-01 : f32
        %296 = vector.broadcast %cst_79 : f32 to vector<6x1xf32>
        %297 = arith.mulf %296, %283 : vector<6x1xf32>
        %298 = arith.subf %275, %297 : vector<6x1xf32>
        %299 = vector.broadcast %298 : vector<6x1xf32> to vector<6x100xf32>
        %300 = vector.broadcast %28 : vector<1x100xf32> to vector<6x100xf32>
        %301 = arith.maximumf %299, %300 : vector<6x100xf32>
        %302 = arith.subf %295, %301 : vector<6x100xf32>
        %cst_80 = arith.constant 5.000000e-01 : f32
        %303 = vector.broadcast %cst_80 : f32 to vector<6x1xf32>
        %304 = arith.mulf %303, %287 : vector<6x1xf32>
        %305 = arith.addf %279, %304 : vector<6x1xf32>
        %306 = vector.broadcast %305 : vector<6x1xf32> to vector<6x100xf32>
        %307 = vector.broadcast %37 : vector<1x100xf32> to vector<6x100xf32>
        %308 = arith.minimumf %306, %307 : vector<6x100xf32>
        %cst_81 = arith.constant 5.000000e-01 : f32
        %309 = vector.broadcast %cst_81 : f32 to vector<6x1xf32>
        %310 = arith.mulf %309, %287 : vector<6x1xf32>
        %311 = arith.subf %279, %310 : vector<6x1xf32>
        %312 = vector.broadcast %311 : vector<6x1xf32> to vector<6x100xf32>
        %313 = vector.broadcast %34 : vector<1x100xf32> to vector<6x100xf32>
        %314 = arith.maximumf %312, %313 : vector<6x100xf32>
        %315 = arith.subf %308, %314 : vector<6x100xf32>
        %cst_82 = arith.constant 0.000000e+00 : f32
        %316 = vector.broadcast %cst_82 : f32 to vector<6x100xf32>
        %317 = arith.cmpf ogt, %302, %316 : vector<6x100xf32>
        %cst_83 = arith.constant 0.000000e+00 : f32
        %318 = vector.broadcast %cst_83 : f32 to vector<6x100xf32>
        %319 = arith.cmpf ogt, %315, %318 : vector<6x100xf32>
        %320 = arith.andi %317, %319 : vector<6x100xi1>
        %321 = arith.mulf %302, %315 : vector<6x100xf32>
        %cst_84 = arith.constant 0.000000e+00 : f32
        %322 = vector.broadcast %cst_84 : f32 to vector<6x100xf32>
        %323 = arith.select %320, %321, %322 : vector<6x100xi1>, vector<6x100xf32>
        %324 = arith.mulf %283, %287 : vector<6x1xf32>
        %325 = vector.broadcast %324 : vector<6x1xf32> to vector<6x100xf32>
        %326 = vector.broadcast %38 : vector<1x100xf32> to vector<6x100xf32>
        %327 = arith.addf %325, %326 : vector<6x100xf32>
        %328 = arith.subf %327, %323 : vector<6x100xf32>
        %cst_85 = arith.constant 0.000000e+00 : f32
        %329 = vector.broadcast %cst_85 : f32 to vector<6x100xf32>
        %330 = arith.cmpf ogt, %328, %329 : vector<6x100xf32>
        %331 = vector.broadcast %cst_6 : f32 to vector<6x100xf32>
        %332 = arith.mulf %331, %328 : vector<6x100xf32>
        %333 = arith.cmpf ogt, %323, %332 : vector<6x100xf32>
        %334 = arith.andi %330, %333 : vector<6x100xi1>
        %335 = vector.broadcast %cst : f32 to vector<6x100xf32>
        %336 = arith.cmpf ogt, %289, %335 : vector<6x100xf32>
        %337 = vector.broadcast %258 : vector<6x1xi1> to vector<6x100xi1>
        %338 = arith.andi %336, %337 : vector<6x100xi1>
        %339 = arith.andi %334, %338 : vector<6x100xi1>
        %cst_86 = arith.constant 0.000000e+00 : f32
        %340 = vector.broadcast %cst_86 : f32 to vector<6x100xf32>
        %341 = arith.select %339, %340, %252 : vector<6x100xi1>, vector<6x100xf32>
        %342 = vector.broadcast %cst : f32 to vector<6x100xf32>
        %343 = arith.select %339, %342, %289 : vector<6x100xi1>, vector<6x100xf32>
        %c3_i32 = arith.constant 3 : i32
        %cst_87 = arith.constant dense<0xFF800000> : vector<6xf32>
        %344 = vector.multi_reduction <maximumf>, %343, %cst_87 [1] : vector<6x100xf32> to vector<6xf32>
        %345 = vector.shape_cast %344 : vector<6xf32> to vector<6x1xf32>
        %346 = vector.broadcast %cst : f32 to vector<6x1xf32>
        %347 = arith.cmpf ogt, %345, %346 : vector<6x1xf32>
        %348 = vector.broadcast %345 : vector<6x1xf32> to vector<6x100xf32>
        %349 = arith.cmpf oeq, %343, %348 : vector<6x100xf32>
        %350 = vector.broadcast %cst_22 : f32 to vector<6x100xf32>
        %351 = arith.select %349, %44, %350 : vector<6x100xi1>, vector<6x100xf32>
        %cst_88 = arith.constant dense<0x7F800000> : vector<6xf32>
        %352 = vector.multi_reduction <minimumf>, %351, %cst_88 [1] : vector<6x100xf32> to vector<6xf32>
        %353 = vector.shape_cast %352 : vector<6xf32> to vector<6x1xf32>
        %354 = vector.broadcast %353 : vector<6x1xf32> to vector<6x100xf32>
        %355 = arith.cmpf oeq, %44, %354 : vector<6x100xf32>
        %356 = vector.broadcast %347 : vector<6x1xi1> to vector<6x100xi1>
        %357 = arith.andi %355, %356 : vector<6x100xi1>
        %cst_89 = arith.constant 1.000000e+00 : f32
        %cst_90 = arith.constant 0.000000e+00 : f32
        %358 = vector.broadcast %cst_89 : f32 to vector<6x100xf32>
        %359 = vector.broadcast %cst_90 : f32 to vector<6x100xf32>
        %360 = arith.select %357, %358, %359 : vector<6x100xi1>, vector<6x100xf32>
        %361 = vector.broadcast %22 : vector<1x100xf32> to vector<6x100xf32>
        %362 = arith.mulf %360, %361 : vector<6x100xf32>
        %cst_91 = arith.constant dense<0.000000e+00> : vector<6xf32>
        %363 = vector.multi_reduction <add>, %362, %cst_91 [1] : vector<6x100xf32> to vector<6xf32>
        %364 = vector.shape_cast %363 : vector<6xf32> to vector<6x1xf32>
        %365 = vector.broadcast %23 : vector<1x100xf32> to vector<6x100xf32>
        %366 = arith.mulf %360, %365 : vector<6x100xf32>
        %cst_92 = arith.constant dense<0.000000e+00> : vector<6xf32>
        %367 = vector.multi_reduction <add>, %366, %cst_92 [1] : vector<6x100xf32> to vector<6xf32>
        %368 = vector.shape_cast %367 : vector<6xf32> to vector<6x1xf32>
        %369 = vector.broadcast %24 : vector<1x100xf32> to vector<6x100xf32>
        %370 = arith.mulf %360, %369 : vector<6x100xf32>
        %cst_93 = arith.constant dense<0.000000e+00> : vector<6xf32>
        %371 = vector.multi_reduction <add>, %370, %cst_93 [1] : vector<6x100xf32> to vector<6xf32>
        %372 = vector.shape_cast %371 : vector<6xf32> to vector<6x1xf32>
        %373 = vector.broadcast %25 : vector<1x100xf32> to vector<6x100xf32>
        %374 = arith.mulf %360, %373 : vector<6x100xf32>
        %cst_94 = arith.constant dense<0.000000e+00> : vector<6xf32>
        %375 = vector.multi_reduction <add>, %374, %cst_94 [1] : vector<6x100xf32> to vector<6xf32>
        %376 = vector.shape_cast %375 : vector<6xf32> to vector<6x1xf32>
        %377 = vector.broadcast %cst : f32 to vector<6x100xf32>
        %378 = arith.select %357, %377, %343 : vector<6x100xi1>, vector<6x100xf32>
        %cst_95 = arith.constant 5.000000e-01 : f32
        %379 = vector.broadcast %cst_95 : f32 to vector<6x1xf32>
        %380 = arith.mulf %379, %372 : vector<6x1xf32>
        %381 = arith.addf %364, %380 : vector<6x1xf32>
        %382 = vector.broadcast %381 : vector<6x1xf32> to vector<6x100xf32>
        %383 = vector.broadcast %31 : vector<1x100xf32> to vector<6x100xf32>
        %384 = arith.minimumf %382, %383 : vector<6x100xf32>
        %cst_96 = arith.constant 5.000000e-01 : f32
        %385 = vector.broadcast %cst_96 : f32 to vector<6x1xf32>
        %386 = arith.mulf %385, %372 : vector<6x1xf32>
        %387 = arith.subf %364, %386 : vector<6x1xf32>
        %388 = vector.broadcast %387 : vector<6x1xf32> to vector<6x100xf32>
        %389 = vector.broadcast %28 : vector<1x100xf32> to vector<6x100xf32>
        %390 = arith.maximumf %388, %389 : vector<6x100xf32>
        %391 = arith.subf %384, %390 : vector<6x100xf32>
        %cst_97 = arith.constant 5.000000e-01 : f32
        %392 = vector.broadcast %cst_97 : f32 to vector<6x1xf32>
        %393 = arith.mulf %392, %376 : vector<6x1xf32>
        %394 = arith.addf %368, %393 : vector<6x1xf32>
        %395 = vector.broadcast %394 : vector<6x1xf32> to vector<6x100xf32>
        %396 = vector.broadcast %37 : vector<1x100xf32> to vector<6x100xf32>
        %397 = arith.minimumf %395, %396 : vector<6x100xf32>
        %cst_98 = arith.constant 5.000000e-01 : f32
        %398 = vector.broadcast %cst_98 : f32 to vector<6x1xf32>
        %399 = arith.mulf %398, %376 : vector<6x1xf32>
        %400 = arith.subf %368, %399 : vector<6x1xf32>
        %401 = vector.broadcast %400 : vector<6x1xf32> to vector<6x100xf32>
        %402 = vector.broadcast %34 : vector<1x100xf32> to vector<6x100xf32>
        %403 = arith.maximumf %401, %402 : vector<6x100xf32>
        %404 = arith.subf %397, %403 : vector<6x100xf32>
        %cst_99 = arith.constant 0.000000e+00 : f32
        %405 = vector.broadcast %cst_99 : f32 to vector<6x100xf32>
        %406 = arith.cmpf ogt, %391, %405 : vector<6x100xf32>
        %cst_100 = arith.constant 0.000000e+00 : f32
        %407 = vector.broadcast %cst_100 : f32 to vector<6x100xf32>
        %408 = arith.cmpf ogt, %404, %407 : vector<6x100xf32>
        %409 = arith.andi %406, %408 : vector<6x100xi1>
        %410 = arith.mulf %391, %404 : vector<6x100xf32>
        %cst_101 = arith.constant 0.000000e+00 : f32
        %411 = vector.broadcast %cst_101 : f32 to vector<6x100xf32>
        %412 = arith.select %409, %410, %411 : vector<6x100xi1>, vector<6x100xf32>
        %413 = arith.mulf %372, %376 : vector<6x1xf32>
        %414 = vector.broadcast %413 : vector<6x1xf32> to vector<6x100xf32>
        %415 = vector.broadcast %38 : vector<1x100xf32> to vector<6x100xf32>
        %416 = arith.addf %414, %415 : vector<6x100xf32>
        %417 = arith.subf %416, %412 : vector<6x100xf32>
        %cst_102 = arith.constant 0.000000e+00 : f32
        %418 = vector.broadcast %cst_102 : f32 to vector<6x100xf32>
        %419 = arith.cmpf ogt, %417, %418 : vector<6x100xf32>
        %420 = vector.broadcast %cst_6 : f32 to vector<6x100xf32>
        %421 = arith.mulf %420, %417 : vector<6x100xf32>
        %422 = arith.cmpf ogt, %412, %421 : vector<6x100xf32>
        %423 = arith.andi %419, %422 : vector<6x100xi1>
        %424 = vector.broadcast %cst : f32 to vector<6x100xf32>
        %425 = arith.cmpf ogt, %378, %424 : vector<6x100xf32>
        %426 = vector.broadcast %347 : vector<6x1xi1> to vector<6x100xi1>
        %427 = arith.andi %425, %426 : vector<6x100xi1>
        %428 = arith.andi %423, %427 : vector<6x100xi1>
        %cst_103 = arith.constant 0.000000e+00 : f32
        %429 = vector.broadcast %cst_103 : f32 to vector<6x100xf32>
        %430 = arith.select %428, %429, %341 : vector<6x100xi1>, vector<6x100xf32>
        %431 = vector.broadcast %cst : f32 to vector<6x100xf32>
        %432 = arith.select %428, %431, %378 : vector<6x100xi1>, vector<6x100xf32>
        %c4_i32_104 = arith.constant 4 : i32
        %433 = vector.broadcast %cst : f32 to vector<6x100xf32>
        %434 = arith.cmpf ogt, %432, %433 : vector<6x100xf32>
        %cst_105 = arith.constant 1.000000e+00 : f32
        %cst_106 = arith.constant 0.000000e+00 : f32
        %435 = vector.broadcast %cst_105 : f32 to vector<6x100xf32>
        %436 = vector.broadcast %cst_106 : f32 to vector<6x100xf32>
        %437 = arith.select %434, %435, %436 : vector<6x100xi1>, vector<6x100xf32>
        %438 = vector.shape_cast %437 : vector<6x100xf32> to vector<1x6x100xf32>
        %cst_107 = arith.constant dense<0xFF800000> : vector<1xf32>
        %439 = vector.multi_reduction <maximumf>, %438, %cst_107 [1, 2] : vector<1x6x100xf32> to vector<1xf32>
        %440 = vector.shape_cast %439 : vector<1xf32> to vector<1x1x1xf32>
        %441 = vector.extract %440[0, 0, 0] : f32 from vector<1x1x1xf32>
        %c1_i32_108 = arith.constant 1 : i32
        %442 = arith.addi %arg5, %c1_i32_108 : i32
        scf.yield %442, %430, %432, %441 : i32, vector<6x100xf32>, vector<6x100xf32>, f32
      }
      %cst_24 = arith.constant 0.000000e+00 : f32
      %61 = vector.broadcast %cst_24 : f32 to vector<6x100xf32>
      %cst_25 = arith.constant 1.000000e+02 : f32
      %c0_i32_26 = arith.constant 0 : i32
      %c10_i32 = arith.constant 10 : i32
      %62 = arith.addi %c0_i32_26, %c10_i32 : i32
      %c1_i32_27 = arith.constant 1 : i32
      %63 = scf.for %arg5 = %c0_i32_26 to %62 step %c1_i32_27 iter_args(%arg6 = %61) -> (vector<6x100xf32>)  : i32 {
        %cst_34 = arith.constant 0.000000e+00 : f32
        %77 = vector.broadcast %cst_34 : f32 to vector<6x100xf32>
        %78 = arith.cmpf ogt, %60#1, %77 : vector<6x100xf32>
        %cst_35 = arith.constant 0.000000e+00 : f32
        %79 = vector.broadcast %cst_35 : f32 to vector<6x100xf32>
        %80 = arith.cmpf oeq, %arg6, %79 : vector<6x100xf32>
        %81 = arith.andi %78, %80 : vector<6x100xi1>
        %82 = vector.broadcast %cst : f32 to vector<6x100xf32>
        %83 = arith.select %81, %60#1, %82 : vector<6x100xi1>, vector<6x100xf32>
        %cst_36 = arith.constant dense<0xFF800000> : vector<6xf32>
        %84 = vector.multi_reduction <maximumf>, %83, %cst_36 [1] : vector<6x100xf32> to vector<6xf32>
        %85 = vector.shape_cast %84 : vector<6xf32> to vector<6x1xf32>
        %86 = vector.broadcast %cst : f32 to vector<6x1xf32>
        %87 = arith.cmpf ogt, %85, %86 : vector<6x1xf32>
        %88 = vector.broadcast %85 : vector<6x1xf32> to vector<6x100xf32>
        %89 = arith.cmpf oeq, %83, %88 : vector<6x100xf32>
        %90 = vector.broadcast %cst_25 : f32 to vector<6x100xf32>
        %91 = arith.select %89, %44, %90 : vector<6x100xi1>, vector<6x100xf32>
        %cst_37 = arith.constant dense<0x7F800000> : vector<6xf32>
        %92 = vector.multi_reduction <minimumf>, %91, %cst_37 [1] : vector<6x100xf32> to vector<6xf32>
        %93 = vector.shape_cast %92 : vector<6xf32> to vector<6x1xf32>
        %94 = vector.broadcast %93 : vector<6x1xf32> to vector<6x100xf32>
        %95 = arith.cmpf oeq, %44, %94 : vector<6x100xf32>
        %96 = vector.broadcast %87 : vector<6x1xi1> to vector<6x100xi1>
        %97 = arith.andi %95, %96 : vector<6x100xi1>
        %cst_38 = arith.constant 1.000000e+00 : f32
        %cst_39 = arith.constant 0.000000e+00 : f32
        %98 = vector.broadcast %cst_38 : f32 to vector<6x100xf32>
        %99 = vector.broadcast %cst_39 : f32 to vector<6x100xf32>
        %100 = arith.select %97, %98, %99 : vector<6x100xi1>, vector<6x100xf32>
        %101 = arith.addf %arg6, %100 : vector<6x100xf32>
        scf.yield %101 : vector<6x100xf32>
      }
      %cst_28 = arith.constant 0.000000e+00 : f32
      %64 = vector.broadcast %cst_28 : f32 to vector<6x100xf32>
      %65 = arith.cmpf ogt, %60#1, %64 : vector<6x100xf32>
      %cst_29 = arith.constant 0.000000e+00 : f32
      %66 = vector.broadcast %cst_29 : f32 to vector<6x100xf32>
      %67 = arith.cmpf oeq, %63, %66 : vector<6x100xf32>
      %68 = arith.andi %65, %67 : vector<6x100xi1>
      %cst_30 = arith.constant 0.000000e+00 : f32
      %69 = vector.broadcast %cst_30 : f32 to vector<6x100xf32>
      %70 = arith.select %68, %69, %60#1 : vector<6x100xi1>, vector<6x100xf32>
      %71 = vector.shape_cast %19 : vector<6x1xi1> to vector<6x1xi1>
      %72 = vector.broadcast %71 : vector<6x1xi1> to vector<6x100xi1>
      %73 = arith.select %72, %70, %1 : vector<6x100xi1>, vector<6x100xf32>
      %c0_31 = arith.constant 0 : index
      %c0_32 = arith.constant 0 : index
      %c0_33 = arith.constant 0 : index
      %74 = vector.load %arg4[%c0_31, %c0_32, %c0_33] : memref<1x6x100xf32, #tpu.memory_space<vmem>>, vector<1x6x100xf32>
      %75 = vector.shape_cast %74 : vector<1x6x100xf32> to vector<6x100xf32>
      %76 = vector.shape_cast %73 : vector<6x100xf32> to vector<1x6x100xf32>
      tpu.vector_store %arg4[%c0_31, %c0_32, %c0_33], %76 {strides = array<i32>} : memref<1x6x100xf32, #tpu.memory_space<vmem>>, vector<1x6x100xf32>,
    } else {
    }
    return
  }
  func.func @transform_0(%arg0: i32, %arg1: i32) -> (i32, i32, i32) {
    %c0_i32 = arith.constant 0 : i32
    %c0_i32_0 = arith.constant 0 : i32
    %c0_i32_1 = arith.constant 0 : i32
    return %arg0, %c0_i32, %c0_i32_0 : i32, i32, i32
  }
  func.func @transform_1(%arg0: i32, %arg1: i32) -> (i32, i32, i32) {
    %c0_i32 = arith.constant 0 : i32
    %c0_i32_0 = arith.constant 0 : i32
    return %arg0, %arg1, %c0_i32 : i32, i32, i32
  }
  func.func @transform_2(%arg0: i32, %arg1: i32) -> (i32, i32, i32) {
    %c0_i32 = arith.constant 0 : i32
    %c0_i32_0 = arith.constant 0 : i32
    return %arg0, %arg1, %c0_i32 : i32, i32, i32
  }
}

</mosaic_0001>

<bundles_post_ra>
// kernel: tpu_custom_call.1
= control target key start
LH: loop header
LB: loop body
LE: loop exit
PB: predicated region body
PF: predicated region fallthrough
CT: control target
= control target key end

     0   :  { %s858_s9 = smov 0   ;;  %s860_s10 = smov 0   ;;  %s1111_s0 = inlined_call_operand.vmem [shape: f32[2,4,100], index: 0, kind: input, shape index: {}]   ;;  %s1112_s1 = inlined_call_operand.vmem [shape: f32[2,6,100], index: 1, kind: input, shape index: {}]   ;;  %s1113_s2 = inlined_call_operand.vmem [shape: f32[2,6,100], index: 2, kind: output, shape index: {}]  }
   0x1   :  { %s862_s11 = smov 0  }
   0x2 LB: > { %s24_s12 = sadd.s32 1, %s810_s10  ;;  %p682_p0 = scmp.ge.s32.totalorder %s814_s11, 1  ;;  %s814_s11 = sphi %s862_s11, %s12_s11   ;;  %s810_s10 = sphi %s860_s10, %s1131_s10   ;;  %s806_s9 = sphi %s858_s9, %s1130_s9  }
   0x3   : > { %p26_p1 = scmp.ge.s32.totalorder %s24_s12, 2  ;;  %p139_p2 = scmp.lt.s32.totalorder %s814_s11, 3 }
   0x5   : > { %s1133_s12 = smov (%p26_p1, %s24_s12), 0  ;;  %p140_p3 = pnand %p682_p0, %p139_p2 }
   0x6   : > { %p169_p4 = scmp.lt.s32.totalorder (!%p140_p3), %s806_s9, 1  ;;  %v198_v0 = vlaneseq (!%p140_p3)  ;;  %vm188_vm2 = vcmask (!%p140_p3), 816128   ;;  %v840_v15 = vmov (!%p140_p3), 0.0  }
   0x7   : > { %143 = sbr.rel (%p140_p3) target bundleno = 2591 (0xa1f), region = 28 }
   0x8   : > { %v876_v1 = vshrl.u32 (!%p140_p3), %v198_v0, 7  ;;  %v219_v2 = vand.u32 (!%p140_p3), 127, %v198_v0 }
   0xa   : > { %vm202_vm0 = vcmp.ge.s32.totalorder (!%p140_p3), %v876_v1, 1  ;;  %vm203_vm1 = vcmp.lt.s32.totalorder (!%p140_p3), %v876_v1, 4  ;;  %v880_v3 = vcvt.s32.f32 (!%p140_p3), %v219_v2 }
   0xb   : > { %vm900_vm3 = vmand (!%p140_p3), %vm202_vm0, %vm203_vm1 }
   0xe   : > { %s1135_s9 = smov (!%p169_p4, %s806_s9), 1 }
   0xf   : > { %s683_s13 = sshll.u32 %s1135_s9, 2  ;;  %s684_s14 = sshll.u32 %s1135_s9, 3 }
  0x10   : > { %s172_s17 = scalar_lea.vmem %s1111_s0, %s683_s13  ;;  %s179_s20 = scalar_lea.vmem %s1112_s1, %s684_s14 }
  0x11   : > { %s891_s23 = scalar_lea.vmem %s1113_s2, %s684_s14  ;;  %v893_v4 = vld [vmem:[%s179_s20] sm:$0x3f] }
  0x12   : > { %v895_v5 = vld [vmem:[%s172_s17] sm:$0xf]  ;;  %189 = vst.msk [vmem:[%s891_s23] sm:$0x3f] %vm188_vm2, %v893_v4  ;;  %vm216_vm4 = vcmp.le.f32.partialorder %v893_v4, 0.05 }
  0x13   : > { %v206_v7 = vmul.f32 0.5, %v895_v5  ;;  %v213_v8 = vrot.slane %v895_v5, 1  ;;  %v217_v9 = vsel %vm216_vm4, 0.0, %v893_v4  }
  0x14   : > { %vm221_vm5 = vcmp.ne.f32.partialorder %v217_v9, 0.0  ;;  %v1116_v25 = vmov %v217_v9 }
  0x15   : > { %v208_v10 = vrot.slane %v206_v7, 2  ;;  %v909_v11 = vmul.f32 %v213_v8, %v895_v5  ;;  %vm224_vm6 = vmand %vm900_vm3, %vm221_vm5 }
  0x16   : > { %v225_v14 = vsel %vm224_vm6, %v217_v9, -inf  }
  0x17   : > { %v914_v12 = vsub.f32 %v895_v5, %v208_v10  ;;  %v917_v13 = vadd.f32 %v208_v10, %v895_v5  ;;  %vm226_vm7 = vcmp.gt.f32.partialorder %v225_v14, -inf }
  0x18   : > { %v227_v16 = vsel %vm226_vm7, 1.0, %v840_v15 }
  0x19   : > { %v228_v17 = vsel %vm188_vm2, %v227_v16, -inf }
  0x1a   : > { %229 = vmax.xlane.f32.xlu0 %v228_v17 }
  0xa7   : > { %v230_v18 = vpop.xlane.xlu0 %229 }
  0xa8   : > { %v231_v19 = vrot.slane %v230_v18, 4 }
  0xaa   : > { %v232_v20 = vmax.f32 %v230_v18, %v231_v19 }
  0xac   : > { %v233_v21 = vrot.slane %v232_v20, 2 }
  0xae   : > { %v234_v22 = vmax.f32 %v232_v20, %v233_v21 }
  0xb0   : > { %v235_v23 = vrot.slane %v234_v22, 1 }
  0xb2   : > { %v236_v24 = vmax.f32 %v234_v22, %v235_v23 }
  0xb4   : > { %689 = vpush %v236_v24 }
  0xe5   : > { %s690_s24 = spop %689 }
  0xe6   : > { %p627_p5 = scmp.gt.f32.partialorder %s690_s24, 0.0 }
  0xe7   : > { %s926_s25 = smov (%p627_p5), 0  }
  0xe8   : > { %629 = sbr.rel (!%p627_p5) target bundleno = 2289 (0x8f1), region = 73 }
  0xef LB: >> { %v249_v26 = vsel %vm188_vm2, %v818_v14, -inf  ;;  %v281_v30 = vsub.s32 2, %v876_v1  ;;  %v265_v31 = vsub.s32 0, %v876_v1  ;;  %v289_v32 = vsub.s32 3, %v876_v1  ;;  %s537_s25 = sadd.s32 1, %s826_s25   ;;  %s826_s25 = sphi %s926_s25, %s537_s25   ;;  %v822_v9 = vphi %v217_v9, %v1128_v9   ;;  %v818_v14 = vphi %v225_v14, %v1127_v14  }
  0xf0   : >> { %250 = vmax.xlane.f32.xlu0 %v249_v26  ;;  %v273_v37 = vsub.s32 1, %v876_v1  ;;  %v841_v38 = vmov 0.0   ;;  %p243_p6 = scmp.lt.s32.totalorder %s537_s25, 25 }
  0xf1   : >> { %v942_v34 = vrot.slane %v895_v5, %v281_v30  ;;  %v945_v35 = vrot.slane %v895_v5, %v265_v31  ;;  %v949_v36 = vrot.slane %v895_v5, %v289_v32  ;;  %v969_v54 = vrot.slane %v917_v13, %v265_v31 }
  0xf2   : >> { %v963_v47 = vrot.slane %v895_v5, %v273_v37  ;;  %v972_v55 = vrot.slane %v914_v12, %v265_v31  ;;  %v975_v59 = vrot.slane %v917_v13, %v273_v37  ;;  %v980_v63 = vrot.slane %v914_v12, %v273_v37 }
  0xf3   : >> { %v985_v15 = vrot.slane %v909_v11, %v281_v30 }
 0x17d   : >> { %v251_v27 = vpop.xlane.xlu0 %250 }
 0x17e   : >> { %vm253_vm8 = vcmp.eq.f32.partialorder %v818_v14, %v251_v27  ;;  %vm252_vm9 = vcmp.gt.f32.partialorder %v251_v27, -inf }
 0x17f   : >> { %v254_v28 = vsel %vm253_vm8, %v880_v3, 100.0 }
 0x180   : >> { %v255_v29 = vsel %vm188_vm2, %v254_v28, inf }
 0x181   : >> { %256 = vmin.xlane.f32.xlu0 %v255_v29 }
 0x20e   : >> { %v257_v33 = vpop.xlane.xlu0 %256 }
 0x20f   : >> { %vm258_vm10 = vcmp.eq.f32.partialorder %v880_v3, %v257_v33 }
 0x210   : >> { %vm261_vm11 = vmand %vm258_vm10, %vm252_vm9 }
 0x211   : >> { %v262_v39 = vsel %vm261_vm11, 1.0, %v841_v38  ;;  %v295_v40 = vsel %vm261_vm11, -inf, %v818_v14 }
 0x212   : >> { %vm340_vm12 = vcmp.gt.f32.partialorder %v295_v40, -inf  ;;  %v283_v41 = vmul.f32 %v942_v34, %v262_v39  ;;  %v267_v42 = vmul.f32 %v945_v35, %v262_v39  ;;  %v291_v46 = vmul.f32 %v949_v36, %v262_v39 }
 0x213   : >> { %vm955_vm13 = vmand %vm340_vm12, %vm252_vm9  ;;  %v275_v49 = vmul.f32 %v963_v47, %v262_v39 }
 0x214   : >> { %v284_v44 = vsel %vm188_vm2, %v283_v41, 0.0  ;;  %v268_v45 = vsel %vm188_vm2, %v267_v42, 0.0  ;;  %v292_v48 = vsel %vm188_vm2, %v291_v46, 0.0 }
 0x215   : >> { %285 = vadd.xlane.f32.xlu1 %v284_v44  ;;  %269 = vadd.xlane.f32.xlu0 %v268_v45  ;;  %v276_v50 = vsel %vm188_vm2, %v275_v49, 0.0 }
 0x219   : >> { %293 = vadd.xlane.f32.xlu1 %v292_v48 }
 0x21d   : >> { %277 = vadd.xlane.f32.xlu1 %v276_v50 }
 0x2a2   : >> { %v286_v51 = vpop.xlane.xlu1 %285  ;;  %v270_v53 = vpop.xlane.xlu0 %269 }
 0x2a3   : >> { %v296_v52 = vmul.f32 0.5, %v286_v51 }
 0x2a5   : >> { %v297_v56 = vadd.f32 %v296_v52, %v270_v53  ;;  %v303_v57 = vsub.f32 %v270_v53, %v296_v52 }
 0x2a6   : >> { %v294_v58 = vpop.xlane.xlu1 %293 }
 0x2a7   : >> { %v302_v60 = vmin.f32 %v297_v56, %v969_v54  ;;  %v308_v61 = vmax.f32 %v303_v57, %v972_v55  ;;  %v310_v62 = vmul.f32 0.5, %v294_v58  ;;  %v329_v16 = vmul.f32 %v294_v58, %v286_v51 }
 0x2a9   : >> { %v309_v8 = vsub.f32 %v302_v60, %v308_v61  ;;  %v334_v19 = vadd.f32 %v985_v15, %v329_v16 }
 0x2aa   : >> { %v278_v0 = vpop.xlane.xlu1 %277 }
 0x2ab   : >> { %v311_v2 = vadd.f32 %v310_v62, %v278_v0  ;;  %v317_v7 = vsub.f32 %v278_v0, %v310_v62  ;;  %vm324_vm14 = vcmp.gt.f32.partialorder %v309_v8, 0.0 }
 0x2ad   : >> { %v316_v10 = vmin.f32 %v311_v2, %v975_v59  ;;  %v322_v14 = vmax.f32 %v317_v7, %v980_v63 }
 0x2af   : >> { %v323_v17 = vsub.f32 %v316_v10, %v322_v14 }
 0x2b1   : >> { %vm325_vm15 = vcmp.gt.f32.partialorder %v323_v17, 0.0  ;;  %v327_v18 = vmul.f32 %v323_v17, %v309_v8 }
 0x2b2   : >> { %vm326_vm0 = vmand %vm324_vm14, %vm325_vm15 }
 0x2b3   : >> { %v328_v20 = vsel %vm326_vm0, %v327_v18, 0.0 }
 0x2b4   : >> { %v335_v21 = vsub.f32 %v334_v19, %v328_v20 }
 0x2b6   : >> { %v337_v22 = vmul.f32 0.45, %v335_v21  ;;  %vm336_vm1 = vcmp.gt.f32.partialorder %v335_v21, 0.0 }
 0x2b8   : >> { %vm338_vm4 = vcmp.gt.f32.partialorder %v328_v20, %v337_v22 }
 0x2b9   : >> { %vm988_vm5 = vmand %vm336_vm1, %vm338_vm4 }
 0x2ba   : >> { %vm342_vm6 = vmand %vm988_vm5, %vm955_vm13 }
 0x2bb   : >> { %v344_v24 = vsel %vm342_vm6, -inf, %v295_v40  ;;  %v343_v19 = vsel %vm342_vm6, 0.0, %v822_v9 }
 0x2bc   : >> { %v345_v25 = vsel %vm188_vm2, %v344_v24, -inf }
 0x2bd   : >> { %346 = vmax.xlane.f32.xlu0 %v345_v25 }
 0x34a   : >> { %v347_v26 = vpop.xlane.xlu0 %346 }
 0x34b   : >> { %vm349_vm7 = vcmp.eq.f32.partialorder %v344_v24, %v347_v26  ;;  %vm348_vm8 = vcmp.gt.f32.partialorder %v347_v26, -inf }
 0x34c   : >> { %v350_v27 = vsel %vm349_vm7, %v880_v3, 100.0 }
 0x34d   : >> { %v351_v28 = vsel %vm188_vm2, %v350_v27, inf }
 0x34e   : >> { %352 = vmin.xlane.f32.xlu1 %v351_v28 }
 0x3db   : >> { %v353_v29 = vpop.xlane.xlu1 %352 }
 0x3dc   : >> { %vm354_vm9 = vcmp.eq.f32.partialorder %v880_v3, %v353_v29 }
 0x3dd   : >> { %vm357_vm10 = vmand %vm354_vm9, %vm348_vm8 }
 0x3de   : >> { %v358_v30 = vsel %vm357_vm10, 1.0, %v841_v38  ;;  %v375_v31 = vsel %vm357_vm10, -inf, %v344_v24 }
 0x3df   : >> { %vm400_vm11 = vcmp.gt.f32.partialorder %v375_v31, -inf  ;;  %v371_v32 = vmul.f32 %v358_v30, %v949_v36  ;;  %v367_v33 = vmul.f32 %v358_v30, %v942_v34  ;;  %v363_v41 = vmul.f32 %v358_v30, %v963_v47 }
 0x3e0   : >> { %vm1008_vm12 = vmand %vm400_vm11, %vm348_vm8  ;;  %v359_v42 = vmul.f32 %v358_v30, %v945_v35 }
 0x3e1   : >> { %v372_v39 = vsel %vm188_vm2, %v371_v32, 0.0  ;;  %v368_v40 = vsel %vm188_vm2, %v367_v33, 0.0  ;;  %v364_v44 = vsel %vm188_vm2, %v363_v41, 0.0 }
 0x3e2   : >> { %373 = vadd.xlane.f32.xlu1 %v372_v39  ;;  %369 = vadd.xlane.f32.xlu0 %v368_v40  ;;  %v360_v45 = vsel %vm188_vm2, %v359_v42, 0.0 }
 0x3e6   : >> { %365 = vadd.xlane.f32.xlu1 %v364_v44  ;;  %361 = vadd.xlane.f32.xlu0 %v360_v45 }
 0x46f   : >> { %v374_v46 = vpop.xlane.xlu1 %373  ;;  %v370_v48 = vpop.xlane.xlu0 %369 }
 0x470   : >> { %v382_v49 = vmul.f32 0.5, %v374_v46  ;;  %v376_v50 = vmul.f32 0.5, %v370_v48  ;;  %v393_v2 = vmul.f32 %v374_v46, %v370_v48 }
 0x472   : >> { %v394_v14 = vadd.f32 %v393_v2, %v985_v15 }
 0x473   : >> { %v366_v51 = vpop.xlane.xlu1 %365  ;;  %v362_v52 = vpop.xlane.xlu0 %361 }
 0x474   : >> { %v383_v53 = vadd.f32 %v382_v49, %v366_v51  ;;  %v385_v56 = vsub.f32 %v366_v51, %v382_v49  ;;  %v377_v57 = vadd.f32 %v376_v50, %v362_v52  ;;  %v379_v58 = vsub.f32 %v362_v52, %v376_v50 }
 0x476   : >> { %v384_v60 = vmin.f32 %v383_v53, %v975_v59  ;;  %v386_v61 = vmax.f32 %v385_v56, %v980_v63  ;;  %v378_v62 = vmin.f32 %v377_v57, %v969_v54  ;;  %v380_v0 = vmax.f32 %v379_v58, %v972_v55 }
 0x478   : >> { %v387_v7 = vsub.f32 %v384_v60, %v386_v61  ;;  %v381_v8 = vsub.f32 %v378_v62, %v380_v0 }
 0x47a   : >> { %vm389_vm14 = vcmp.gt.f32.partialorder %v387_v7, 0.0  ;;  %vm388_vm15 = vcmp.gt.f32.partialorder %v381_v8, 0.0  ;;  %v391_v10 = vmul.f32 %v387_v7, %v381_v8 }
 0x47b   : >> { %vm390_vm0 = vmand %vm388_vm15, %vm389_vm14 }
 0x47c   : >> { %v392_v16 = vsel %vm390_vm0, %v391_v10, 0.0 }
 0x47d   : >> { %v395_v17 = vsub.f32 %v394_v14, %v392_v16 }
 0x47f   : >> { %v397_v18 = vmul.f32 0.45, %v395_v17  ;;  %vm396_vm1 = vcmp.gt.f32.partialorder %v395_v17, 0.0 }
 0x481   : >> { %vm398_vm4 = vcmp.gt.f32.partialorder %v392_v16, %v397_v18 }
 0x482   : >> { %vm399_vm7 = vmand %vm396_vm1, %vm398_vm4 }
 0x483   : >> { %vm402_vm8 = vmand %vm399_vm7, %vm1008_vm12 }
 0x484   : >> { %v404_v20 = vsel %vm402_vm8, -inf, %v375_v31  ;;  %v403_v21 = vsel %vm402_vm8, 0.0, %v343_v19 }
 0x485   : >> { %v405_v22 = vsel %vm188_vm2, %v404_v20, -inf }
 0x486   : >> { %406 = vmax.xlane.f32.xlu0 %v405_v22 }
 0x513   : >> { %v407_v24 = vpop.xlane.xlu0 %406 }
 0x514   : >> { %vm409_vm9 = vcmp.eq.f32.partialorder %v404_v20, %v407_v24  ;;  %vm408_vm10 = vcmp.gt.f32.partialorder %v407_v24, -inf }
 0x515   : >> { %v410_v25 = vsel %vm409_vm9, %v880_v3, 100.0 }
 0x516   : >> { %v411_v26 = vsel %vm188_vm2, %v410_v25, inf }
 0x517   : >> { %412 = vmin.xlane.f32.xlu1 %v411_v26 }
 0x5a4   : >> { %v413_v23 = vpop.xlane.xlu1 %412 }
 0x5a5   : >> { %vm414_vm13 = vcmp.eq.f32.partialorder %v880_v3, %v413_v23 }
 0x5a6   : >> { %vm417_vm5 = vmand %vm414_vm13, %vm408_vm10 }
 0x5a7   : >> { %v418_v9 = vsel %vm417_vm5, 1.0, %v841_v38  ;;  %v435_v43 = vsel %vm417_vm5, -inf, %v404_v20 }
 0x5a8   : >> { %vm460_vm6 = vcmp.gt.f32.partialorder %v435_v43, -inf  ;;  %v431_v27 = vmul.f32 %v418_v9, %v949_v36  ;;  %v427_v28 = vmul.f32 %v418_v9, %v942_v34  ;;  %v423_v32 = vmul.f32 %v418_v9, %v963_v47 }
 0x5a9   : >> { %vm1038_vm11 = vmand %vm460_vm6, %vm408_vm10  ;;  %v419_v33 = vmul.f32 %v418_v9, %v945_v35 }
 0x5aa   : >> { %v432_v30 = vsel %vm188_vm2, %v431_v27, 0.0  ;;  %v428_v31 = vsel %vm188_vm2, %v427_v28, 0.0  ;;  %v424_v37 = vsel %vm188_vm2, %v423_v32, 0.0 }
 0x5ab   : >> { %433 = vadd.xlane.f32.xlu1 %v432_v30  ;;  %429 = vadd.xlane.f32.xlu0 %v428_v31  ;;  %v420_v39 = vsel %vm188_vm2, %v419_v33, 0.0 }
 0x5af   : >> { %425 = vadd.xlane.f32.xlu1 %v424_v37  ;;  %421 = vadd.xlane.f32.xlu0 %v420_v39 }
 0x638   : >> { %v434_v40 = vpop.xlane.xlu1 %433  ;;  %v430_v41 = vpop.xlane.xlu0 %429 }
 0x639   : >> { %v442_v42 = vmul.f32 0.5, %v434_v40  ;;  %v436_v44 = vmul.f32 0.5, %v430_v41  ;;  %v453_v58 = vmul.f32 %v434_v40, %v430_v41 }
 0x63b   : >> { %v454_v0 = vadd.f32 %v453_v58, %v985_v15 }
 0x63c   : >> { %v426_v45 = vpop.xlane.xlu1 %425  ;;  %v422_v46 = vpop.xlane.xlu0 %421 }
 0x63d   : >> { %v443_v48 = vadd.f32 %v442_v42, %v426_v45  ;;  %v445_v49 = vsub.f32 %v426_v45, %v442_v42  ;;  %v437_v50 = vadd.f32 %v436_v44, %v422_v46  ;;  %v439_v51 = vsub.f32 %v422_v46, %v436_v44 }
 0x63f   : >> { %v444_v52 = vmin.f32 %v443_v48, %v975_v59  ;;  %v446_v53 = vmax.f32 %v445_v49, %v980_v63  ;;  %v438_v56 = vmin.f32 %v437_v50, %v969_v54  ;;  %v440_v57 = vmax.f32 %v439_v51, %v972_v55 }
 0x641   : >> { %v447_v60 = vsub.f32 %v444_v52, %v446_v53  ;;  %v441_v61 = vsub.f32 %v438_v56, %v440_v57 }
 0x643   : >> { %vm449_vm12 = vcmp.gt.f32.partialorder %v447_v60, 0.0  ;;  %vm448_vm14 = vcmp.gt.f32.partialorder %v441_v61, 0.0  ;;  %v451_v62 = vmul.f32 %v447_v60, %v441_v61 }
 0x644   : >> { %vm450_vm15 = vmand %vm448_vm14, %vm449_vm12 }
 0x645   : >> { %v452_v2 = vsel %vm450_vm15, %v451_v62, 0.0 }
 0x646   : >> { %v455_v7 = vsub.f32 %v454_v0, %v452_v2 }
 0x648   : >> { %v457_v8 = vmul.f32 0.45, %v455_v7  ;;  %vm456_vm0 = vcmp.gt.f32.partialorder %v455_v7, 0.0 }
 0x64a   : >> { %vm458_vm1 = vcmp.gt.f32.partialorder %v452_v2, %v457_v8 }
 0x64b   : >> { %vm459_vm4 = vmand %vm456_vm0, %vm458_vm1 }
 0x64c   : >> { %vm462_vm7 = vmand %vm459_vm4, %vm1038_vm11 }
 0x64d   : >> { %v464_v10 = vsel %vm462_vm7, -inf, %v435_v43  ;;  %v463_v14 = vsel %vm462_vm7, 0.0, %v403_v21 }
 0x64e   : >> { %v465_v16 = vsel %vm188_vm2, %v464_v10, -inf }
 0x64f   : >> { %466 = vmax.xlane.f32.xlu0 %v465_v16 }
 0x6dc   : >> { %v467_v17 = vpop.xlane.xlu0 %466 }
 0x6dd   : >> { %vm469_vm8 = vcmp.eq.f32.partialorder %v464_v10, %v467_v17  ;;  %vm468_vm9 = vcmp.gt.f32.partialorder %v467_v17, -inf }
 0x6de   : >> { %v470_v18 = vsel %vm469_vm8, %v880_v3, 100.0 }
 0x6df   : >> { %v471_v19 = vsel %vm188_vm2, %v470_v18, inf }
 0x6e0   : >> { %472 = vmin.xlane.f32.xlu1 %v471_v19 }
 0x76d   : >> { %v473_v20 = vpop.xlane.xlu1 %472 }
 0x76e   : >> { %vm474_vm10 = vcmp.eq.f32.partialorder %v880_v3, %v473_v20 }
 0x76f   : >> { %vm477_vm13 = vmand %vm474_vm10, %vm468_vm9 }
 0x770   : >> { %v478_v22 = vsel %vm477_vm13, 1.0, %v841_v38  ;;  %v495_v24 = vsel %vm477_vm13, -inf, %v464_v10 }
 0x771   : >> { %vm520_vm5 = vcmp.gt.f32.partialorder %v495_v24, -inf  ;;  %v491_v21 = vmul.f32 %v478_v22, %v949_v36  ;;  %v487_v25 = vmul.f32 %v478_v22, %v942_v34  ;;  %v483_v43 = vmul.f32 %v478_v22, %v963_v47 }
 0x772   : >> { %vm1062_vm6 = vmand %vm520_vm5, %vm468_vm9  ;;  %v479_v27 = vmul.f32 %v478_v22, %v945_v35 }
 0x773   : >> { %v492_v23 = vsel %vm188_vm2, %v491_v21, 0.0  ;;  %v488_v9 = vsel %vm188_vm2, %v487_v25, 0.0  ;;  %v484_v28 = vsel %vm188_vm2, %v483_v43, 0.0 }
 0x774   : >> { %493 = vadd.xlane.f32.xlu1 %v492_v23  ;;  %489 = vadd.xlane.f32.xlu0 %v488_v9  ;;  %v480_v36 = vsel %vm188_vm2, %v479_v27, 0.0 }
 0x778   : >> { %485 = vadd.xlane.f32.xlu1 %v484_v28  ;;  %481 = vadd.xlane.f32.xlu0 %v480_v36 }
 0x801   : >> { %v494_v34 = vpop.xlane.xlu1 %493  ;;  %v490_v29 = vpop.xlane.xlu0 %489 }
 0x802   : >> { %v502_v30 = vmul.f32 0.5, %v494_v34  ;;  %v496_v31 = vmul.f32 0.5, %v490_v29  ;;  %v513_v45 = vmul.f32 %v494_v34, %v490_v29 }
 0x804   : >> { %v514_v50 = vadd.f32 %v513_v45, %v985_v15 }
 0x805   : >> { %v486_v32 = vpop.xlane.xlu1 %485  ;;  %v482_v33 = vpop.xlane.xlu0 %481 }
 0x806   : >> { %v503_v37 = vadd.f32 %v502_v30, %v486_v32  ;;  %v505_v39 = vsub.f32 %v486_v32, %v502_v30  ;;  %v497_v40 = vadd.f32 %v496_v31, %v482_v33  ;;  %v499_v47 = vsub.f32 %v482_v33, %v496_v31 }
 0x808   : >> { %v504_v35 = vmin.f32 %v503_v37, %v975_v59  ;;  %v506_v41 = vmax.f32 %v505_v39, %v980_v63  ;;  %v498_v42 = vmin.f32 %v497_v40, %v969_v54  ;;  %v500_v44 = vmax.f32 %v499_v47, %v972_v55 }
 0x80a   : >> { %v507_v46 = vsub.f32 %v504_v35, %v506_v41  ;;  %v501_v48 = vsub.f32 %v498_v42, %v500_v44 }
 0x80c   : >> { %vm509_vm11 = vcmp.gt.f32.partialorder %v507_v46, 0.0  ;;  %vm508_vm12 = vcmp.gt.f32.partialorder %v501_v48, 0.0  ;;  %v511_v49 = vmul.f32 %v507_v46, %v501_v48 }
 0x80d   : >> { %vm510_vm14 = vmand %vm508_vm12, %vm509_vm11 }
 0x80e   : >> { %v512_v51 = vsel %vm510_vm14, %v511_v49, 0.0 }
 0x80f   : >> { %v515_v52 = vsub.f32 %v514_v50, %v512_v51 }
 0x811   : >> { %v517_v53 = vmul.f32 0.45, %v515_v52  ;;  %vm516_vm15 = vcmp.gt.f32.partialorder %v515_v52, 0.0 }
 0x813   : >> { %vm518_vm0 = vcmp.gt.f32.partialorder %v512_v51, %v517_v53 }
 0x814   : >> { %vm519_vm1 = vmand %vm516_vm15, %vm518_vm0 }
 0x815   : >> { %vm522_vm4 = vmand %vm519_vm1, %vm1062_vm6 }
 0x816   : >> { %v524_v54 = vsel %vm522_vm4, -inf, %v495_v24   ;;  %v523_v55 = vsel %vm522_vm4, 0.0, %v463_v14  }
 0x817   : >> { %vm525_vm7 = vcmp.gt.f32.partialorder %v524_v54, -inf  ;;  %v1127_v14 = vmov %v524_v54  ;;  %v1128_v9 = vmov %v523_v55 }
 0x818   : >> { %v526_v59 = vsel %vm525_vm7, 1.0, %v841_v38 }
 0x819   : >> { %v527_v63 = vsel %vm188_vm2, %v526_v59, -inf }
 0x81a   : >> { %528 = vmax.xlane.f32.xlu0 %v527_v63 }
 0x8a7   : >> { %v529_v15 = vpop.xlane.xlu0 %528 }
 0x8a8   : >> { %v530_v56 = vrot.slane %v529_v15, 4 }
 0x8aa   : >> { %v531_v57 = vmax.f32 %v529_v15, %v530_v56 }
 0x8ac   : >> { %v532_v58 = vrot.slane %v531_v57, 2 }
 0x8ae   : >> { %v533_v60 = vmax.f32 %v531_v57, %v532_v58 }
 0x8b0   : >> { %v534_v61 = vrot.slane %v533_v60, 1 }
 0x8b2   : >> { %v535_v62 = vmax.f32 %v533_v60, %v534_v61 }
 0x8b4   : >> { %691 = vpush %v535_v62 }
 0x8e5   : >> { %s692_s26 = spop %691 }
 0x8e6   : >> { %p244_p7 = scmp.gt.f32.partialorder %s692_s26, 0.0 }
 0x8e8   : >> { %p245_p8 = pnand %p244_p7, %p243_p6 }
 0x8e9   : > { %v1129_v25 = vmov (%p245_p8), %v523_v55 }
 0x8ea   : > { %248 = sbr.rel (!%p245_p8) target bundleno = 239 (0xef), region = 79 }
 0x8f1 PF: > { %v832_v38 = vmov 0.0   ;;  %s836_s27 = smov 0   ;;  %v830_v25 = vphi %v1116_v25, %v1129_v25  }
 0x8f2 LB: >> { %vm545_vm8 = vcmp.gt.f32.partialorder %v830_v25, 0.0  ;;  %vm546_vm9 = vcmp.eq.f32.partialorder %v834_v38, 0.0  ;;  %v842_v13 = vmov 0.0   ;;  %s543_s27 = sadd.s32 1, %s838_s27   ;;  %s838_s27 = sphi %s836_s27, %s543_s27   ;;  %v834_v38 = vphi %v832_v38, %v833_v38  }
 0x8f3   : >> { %vm547_vm10 = vmand %vm545_vm8, %vm546_vm9  ;;  %p540_p9 = scmp.ge.s32.totalorder %s543_s27, 10  }
 0x8f4   : >> { %v548_v0 = vsel %vm547_vm10, %v830_v25, -inf }
 0x8f5   : >> { %v549_v2 = vsel %vm188_vm2, %v548_v0, -inf }
 0x8f6   : >> { %550 = vmax.xlane.f32.xlu0 %v549_v2 }
 0x983   : >> { %v551_v1 = vpop.xlane.xlu0 %550 }
 0x984   : >> { %vm553_vm13 = vcmp.eq.f32.partialorder %v548_v0, %v551_v1  ;;  %vm552_vm5 = vcmp.gt.f32.partialorder %v551_v1, -inf }
 0x985   : >> { %v554_v5 = vsel %vm553_vm13, %v880_v3, 100.0 }
 0x986   : >> { %v555_v11 = vsel %vm188_vm2, %v554_v5, inf }
 0x987   : >> { %556 = vmin.xlane.f32.xlu0 %v555_v11 }
 0xa14   : >> { %v557_v12 = vpop.xlane.xlu0 %556  ;;  %542 = sbr.rel (!%p540_p9) target bundleno = 2290 (0x8f2), region = 90 }
 0xa15   : >> { %vm558_vm6 = vcmp.eq.f32.partialorder %v880_v3, %v557_v12 }
 0xa16   : >> { %vm561_vm11 = vmand %vm558_vm6, %vm552_vm5 }
 0xa17   : >> { %v562_v7 = vsel %vm561_vm11, 1.0, %v842_v13 }
 0xa18   : >> { %v563_v8 = vadd.f32 %v834_v38, %v562_v7  }
 0xa1a   : >> { %v833_v38 = vmov %v563_v8   ;;  %vm565_vm12 = vcmp.eq.f32.partialorder (%p540_p9), %v563_v8, 0.0 }
 0xa1b   : > { %vm566_vm14 = vmand %vm545_vm8, %vm565_vm12 }
 0xa1c   : > { %v567_v10 = vsel %vm566_vm14, 0.0, %v830_v25 }
 0xa1d   : > { %v568_v14 = vsel %vm900_vm3, %v567_v10, %v893_v4 }
 0xa1e   : > { %569 = vst.msk [vmem:[%s891_s23] sm:$0x3f] %vm188_vm2, %v568_v14 }
 0xa1f PF: > { %s12_s11 = sadd.s32 1, %s814_s11   ;;  %s1130_s9 = smov %s810_s10 }
 0xa20   : > { %p9_p10 = scmp.ge.s32.totalorder %s12_s11, 4   ;;  %s1131_s10 = smov %s1133_s12 }
 0xa22   :  { %11 = sbr.rel (!%p9_p10) target bundleno = 2 (0x2), region = 101 }

</bundles_post_ra>
